<compile_context>
chip_gen: v5e
topology: v5e:2x2
jax: 0.10.0
libtpu: 0.0.40
codegen_flags: <defaults>
</compile_context>

<pallas_src>
import functools
import math

import jax
import jax.numpy as jnp
from jax.experimental import pallas as pl
from jax.experimental.pallas import tpu as pltpu


def _round_up(x, m):
    return (x + m - 1) // m * m


def _cdiv(a, b):
    return -(-a // b)


def _apply_activation(h, activation):
    if activation == "relu":
        return jnp.maximum(h, 0.0)
    if activation == "tanh":
        return jnp.tanh(h)
    if activation == "sigmoid":
        return jax.nn.sigmoid(h)
    raise ValueError(f"unknown activation {activation!r}")


def _device_vmem_budget():
    """(vmem_cap_bytes, tensorcores_per_chip) for the current TPU generation."""
    kind = ""
    try:
        kind = jax.devices()[0].device_kind.lower()
    except Exception:
        pass
    if "v7" in kind:
        # 64 MiB physical VMEM per TC -> leave room for Mosaic scratch/spills.
        return 48 * 1024 * 1024, 2
    if "v4" in kind or "v5p" in kind:
        # 128 MiB parts with 2 TCs (megacore).
        return 100 * 1024 * 1024, 2
    # v5e / v6e: 128 MiB VMEM, 1 TC per chip.
    return 100 * 1024 * 1024, 1


def _fused_mlp_kernel(*refs, num_layers, activation, final_act):
    # refs = (x_ref, w0, b0, w1, b1, ..., o_ref)
    x_ref = refs[0]
    o_ref = refs[-1]
    wb = refs[1:-1]
    compute_dtype = x_ref.dtype

    h = x_ref[0]                                        # (C, ts)
    for li in range(num_layers):
        w = wb[2 * li][...]                             # (N, K) -- PyTorch layout
        b = wb[2 * li + 1][...]                         # (N, 1), f32
        h = jnp.dot(w, h, preferred_element_type=jnp.float32) + b
        if li < num_layers - 1 or final_act:
            h = _apply_activation(h, activation)        # f32 VPU/EUP math
        if li < num_layers - 1:
            h = h.astype(compute_dtype)                 # keep MXU inputs narrow on bf16 path
    o_ref[0] = h.astype(o_ref.dtype)                    # lane-dense (128-multiple) store


def init_mlp_params(key, input_dim, hidden_dims):
    """Deterministic init matching PyTorch nn.Linear: weight (out, in), bias (out,)."""
    params = []
    last_dim = input_dim
    for nh in hidden_dims:
        key, kw, kb = jax.random.split(key, 3)
        bound = 1.0 / (last_dim ** 0.5)
        w = jax.random.uniform(kw, (nh, last_dim), jnp.float32, -bound, bound)
        b = jax.random.uniform(kb, (nh,), jnp.float32, -bound, bound)
        params.append((w, b))
        last_dim = nh
    return params


def mlp_forward(x, params, final_act=True, activation="relu",
                ts=None, compute_dtype="auto", out_dtype=None):
    """x: (B, C, H, W) NCHW -> (B, hidden_dims[-1], H, W), matching MLP.forward.

    compute_dtype: "auto" (-> bf16 streamed I/O + resident weights, f32 math),
                   None (all f32), or an explicit dtype.
    """
    B, C, H, W = x.shape
    S = H * W
    if compute_dtype == "auto":
        compute_dtype = jnp.bfloat16
    out_dtype = x.dtype if out_dtype is None else out_dtype
    num_layers = len(params)
    n_out = params[-1][0].shape[0]

    xr = x.reshape(B, C, S)                             # pure reshape, no transpose
    if compute_dtype is not None:
        xr = xr.astype(compute_dtype)
    in_itemsize = jnp.dtype(xr.dtype).itemsize
    out_itemsize = jnp.dtype(out_dtype).itemsize

    wbs = []
    for (w, b) in params:
        wbs.append(w if compute_dtype is None else w.astype(compute_dtype))
        wbs.append(b.reshape(-1, 1).astype(jnp.float32))    # bias/act math stays f32
    weight_bytes = sum(a.size * jnp.dtype(a.dtype).itemsize for a in wbs)
    widest = max([C, n_out] + [w.shape[0] for (w, _) in params])

    # ---- Generation-aware tile sizing --------------------------------------
    vmem_cap, num_cores = _device_vmem_budget()

    # Bytes of VMEM needed per spatial lane:
    #   2x double-buffered input block + 2x double-buffered output block
    #   + f32 inter-layer intermediates (live h + produced h + temp headroom).
    per_lane_bytes = (2 * C * in_itemsize
                      + 2 * n_out * out_itemsize
                      + 3 * widest * 4)
    usable = int(0.6 * vmem_cap) - weight_bytes          # headroom for Mosaic scratch
    if ts is None:
        ts_budget = max(128, (max(usable, 0) // max(per_lane_bytes, 1)) // 128 * 128)
        ts_budget = min(ts_budget, 2048)
    else:
        ts_budget = max(128, _round_up(int(ts), 128))

    s_pad128 = _round_up(S, 128)                         # always lane-dense (128-multiple)
    ts_eff = min(ts_budget, s_pad128)
    # Megacore (v7x etc.): make sure both TensorCores get at least one block.
    if num_cores >= 2 and B * _cdiv(s_pad128, ts_eff) < 2 and s_pad128 >= 256:
        ts_eff = max(128, (s_pad128 // 2) // 128 * 128)
    s_pad = _round_up(S, ts_eff)
    if s_pad != S:
        xr = jnp.pad(xr, ((0, 0), (0, 0), (0, s_pad - S)))

    grid = (B, s_pad // ts_eff)

    # ---- Specs --------------------------------------------------------------
    in_specs = [pl.BlockSpec((1, C, ts_eff), lambda b, s: (b, 0, s))]
    for arr in wbs:
        # Full array, constant block index -> stays resident in VMEM across the grid.
        in_specs.append(pl.BlockSpec(arr.shape, lambda b, s: (0, 0)))
    out_specs = pl.BlockSpec((1, n_out, ts_eff), lambda b, s: (b, 0, s))

    # ---- Cost estimate (helps XLA schedule around the custom call) ----------
    m_tokens = B * s_pad
    flops = sum(2 * m_tokens * w.shape[1] * w.shape[0] for (w, _) in params)
    transcendentals = 0
    if activation in ("tanh", "sigmoid"):
        n_act_layers = num_layers if final_act else num_layers - 1
        transcendentals = m_tokens * sum(w.shape[0] for (w, _) in params[:n_act_layers])
    bytes_accessed = (B * C * s_pad * in_itemsize
                      + weight_bytes
                      + B * n_out * s_pad * out_itemsize)
    cost = pl.CostEstimate(flops=int(flops),
                           transcendentals=int(transcendentals),
                           bytes_accessed=int(bytes_accessed))

    # ---- VMEM limit: actual need + ~30% headroom, capped per generation -----
    need = (2 * C * ts_eff * in_itemsize
            + 2 * n_out * ts_eff * out_itemsize
            + weight_bytes
            + 3 * widest * ts_eff * 4)
    vmem_limit = int(min(vmem_cap, need * 13 // 10 + (2 << 20)))

    kernel = functools.partial(_fused_mlp_kernel, num_layers=num_layers,
                               activation=activation, final_act=final_act)

    out = pl.pallas_call(
        kernel,
        out_shape=jax.ShapeDtypeStruct((B, n_out, s_pad), out_dtype),
        grid_spec=pltpu.PrefetchScalarGridSpec(
            num_scalar_prefetch=0,
            grid=grid,
            in_specs=in_specs,
            out_specs=out_specs,
        ),
        compiler_params=pltpu.CompilerParams(
            dimension_semantics=("parallel", "parallel"),
            vmem_limit_bytes=vmem_limit,
        ),
        cost_estimate=cost,
    )(xr, *wbs)

    if s_pad != S:
        out = out[:, :, :S]
    return out.reshape(B, n_out, H, W)


def mlp_reference(x, params, final_act=True, activation="relu"):
    """Pure-JAX replica of MLP.forward (tokens-major, PyTorch math, f32)."""
    B, C, H, W = x.shape
    tok = jnp.transpose(x, (0, 2, 3, 1)).reshape(B * H * W, C)
    n_layers = len(params)
    for li, (w, b) in enumerate(params):
        tok = tok @ w.T + b
        if li < n_layers - 1 or final_act:
            tok = _apply_activation(tok, activation)
    n_out = params[-1][0].shape[0]
    return jnp.transpose(tok.reshape(B, H, W, n_out), (0, 3, 1, 2))


if __name__ == "__main__":
    key = jax.random.PRNGKey(0)
    kx, kp = jax.random.split(key)

    # Main check: small shape consistent with the module.
    B, C, H, W = 2, 4, 16, 16
    hidden_dims = (32, 32)
    x = jax.random.normal(kx, (B, C, H, W), dtype=jnp.float32)
    params = init_mlp_params(kp, C, hidden_dims)
    ref = mlp_reference(x, params, final_act=True, activation="relu")

    # f32 path (tight tolerance).
    out_f32 = jax.block_until_ready(
        mlp_forward(x, params, final_act=True, activation="relu", compute_dtype=None))
    assert out_f32.shape == (B, hidden_dims[-1], H, W), out_f32.shape
    assert jnp.allclose(out_f32, ref, atol=1e-5, rtol=1e-5), \
        float(jnp.max(jnp.abs(out_f32 - ref)))

    # Default bf16-I/O path (loose tolerance; f32 math/accumulation inside).
    out_bf16 = jax.block_until_ready(
        mlp_forward(x, params, final_act=True, activation="relu"))
    assert out_bf16.shape == (B, hidden_dims[-1], H, W), out_bf16.shape
    assert jnp.allclose(out_bf16, ref, atol=1e-1, rtol=5e-2), \
        float(jnp.max(jnp.abs(out_bf16 - ref)))

    # Ragged-spatial / tanh / no-final-act path (exercises 128-padding + slicing).
    kx2, kp2 = jax.random.split(jax.random.PRNGKey(1))
    x2 = jax.random.normal(kx2, (1, 4, 17, 17), dtype=jnp.float32)
    params2 = init_mlp_params(kp2, 4, (16, 8))
    ref2 = mlp_reference(x2, params2, final_act=False, activation="tanh")
    out2 = jax.block_until_ready(
        mlp_forward(x2, params2, final_act=False, activation="tanh", compute_dtype=None))
    assert out2.shape == (1, 8, 17, 17), out2.shape
    assert jnp.allclose(out2, ref2, atol=1e-5, rtol=1e-5), \
        float(jnp.max(jnp.abs(out2 - ref2)))

    print("KERNEL_OK")
</pallas_src>

<mosaic_0001>
module attributes {stable_mosaic.version = 11 : i64} {
  func.func @_fused_mlp_kernel(%arg0: i32, %arg1: i32, %arg2: memref<1x4x256xf32, #tpu.memory_space<vmem>>, %arg3: memref<32x4xf32, #tpu.memory_space<vmem>>, %arg4: memref<32x1xf32, #tpu.memory_space<vmem>>, %arg5: memref<32x32xf32, #tpu.memory_space<vmem>>, %arg6: memref<32x1xf32, #tpu.memory_space<vmem>>, %arg7: memref<1x32x256xf32, #tpu.memory_space<vmem>>) attributes {dimension_semantics = [#tpu.dimension_semantics<parallel>, #tpu.dimension_semantics<parallel>], iteration_bounds = array<i64: 2, 1>, scalar_prefetch = 0 : i64, scratch_operands = 0 : i64, tpu.core_type = #tpu.core_type<tc>, window_params = [{transform_indices = @transform_0, window_bounds = array<i64: 1, 4, 256>}, {pipeline_mode = #tpu.pipeline_mode<synchronous>, transform_indices = @transform_1, window_bounds = array<i64: 32, 4>}, {pipeline_mode = #tpu.pipeline_mode<synchronous>, transform_indices = @transform_2, window_bounds = array<i64: 32, 1>}, {pipeline_mode = #tpu.pipeline_mode<synchronous>, transform_indices = @transform_3, window_bounds = array<i64: 32, 32>}, {pipeline_mode = #tpu.pipeline_mode<synchronous>, transform_indices = @transform_4, window_bounds = array<i64: 32, 1>}, {transform_indices = @transform_5, window_bounds = array<i64: 1, 32, 256>}]} {
    %c0 = arith.constant 0 : index
    %c0_0 = arith.constant 0 : index
    %c0_1 = arith.constant 0 : index
    %0 = vector.load %arg2[%c0, %c0_0, %c0_1] : memref<1x4x256xf32, #tpu.memory_space<vmem>>, vector<1x4x256xf32>
    %1 = vector.shape_cast %0 : vector<1x4x256xf32> to vector<4x256xf32>
    %c0_2 = arith.constant 0 : index
    %c0_3 = arith.constant 0 : index
    %2 = vector.load %arg3[%c0_2, %c0_3] : memref<32x4xf32, #tpu.memory_space<vmem>>, vector<32x4xf32>
    %c0_4 = arith.constant 0 : index
    %c0_5 = arith.constant 0 : index
    %3 = vector.load %arg4[%c0_4, %c0_5] : memref<32x1xf32, #tpu.memory_space<vmem>>, vector<32x1xf32>
    %cst = arith.constant dense<0.000000e+00> : vector<32x256xf32>
    %4 = tpu.matmul %2, %1, %cst {dimension_numbers = #tpu.dot_dimension_numbers<[1], [0], [0], [1], [0, 0, 1, 1], [], []>} : vector<32x4xf32>, vector<4x256xf32>, vector<32x256xf32> -> vector<32x256xf32>
    %5 = vector.broadcast %3 : vector<32x1xf32> to vector<32x256xf32>
    %6 = arith.addf %4, %5 : vector<32x256xf32>
    %cst_6 = arith.constant 0.000000e+00 : f32
    %7 = vector.broadcast %cst_6 : f32 to vector<32x256xf32>
    %8 = arith.maximumf %6, %7 : vector<32x256xf32>
    %c0_7 = arith.constant 0 : index
    %c0_8 = arith.constant 0 : index
    %9 = vector.load %arg5[%c0_7, %c0_8] : memref<32x32xf32, #tpu.memory_space<vmem>>, vector<32x32xf32>
    %c0_9 = arith.constant 0 : index
    %c0_10 = arith.constant 0 : index
    %10 = vector.load %arg6[%c0_9, %c0_10] : memref<32x1xf32, #tpu.memory_space<vmem>>, vector<32x1xf32>
    %cst_11 = arith.constant dense<0.000000e+00> : vector<32x256xf32>
    %11 = tpu.matmul %9, %8, %cst_11 {dimension_numbers = #tpu.dot_dimension_numbers<[1], [0], [0], [1], [0, 0, 1, 1], [], []>} : vector<32x32xf32>, vector<32x256xf32>, vector<32x256xf32> -> vector<32x256xf32>
    %12 = vector.broadcast %10 : vector<32x1xf32> to vector<32x256xf32>
    %13 = arith.addf %11, %12 : vector<32x256xf32>
    %cst_12 = arith.constant 0.000000e+00 : f32
    %14 = vector.broadcast %cst_12 : f32 to vector<32x256xf32>
    %15 = arith.maximumf %13, %14 : vector<32x256xf32>
    %c0_13 = arith.constant 0 : index
    %c0_14 = arith.constant 0 : index
    %c0_15 = arith.constant 0 : index
    %16 = vector.load %arg7[%c0_13, %c0_14, %c0_15] : memref<1x32x256xf32, #tpu.memory_space<vmem>>, vector<1x32x256xf32>
    %17 = vector.shape_cast %16 : vector<1x32x256xf32> to vector<32x256xf32>
    %18 = vector.shape_cast %15 : vector<32x256xf32> to vector<1x32x256xf32>
    tpu.vector_store %arg7[%c0_13, %c0_14, %c0_15], %18 {strides = array<i32>} : memref<1x32x256xf32, #tpu.memory_space<vmem>>, vector<1x32x256xf32>,
    return
  }
  func.func @transform_0(%arg0: i32, %arg1: i32) -> (i32, i32, i32) {
    %c0_i32 = arith.constant 0 : i32
    %c0_i32_0 = arith.constant 0 : i32
    return %arg0, %c0_i32, %arg1 : i32, i32, i32
  }
  func.func @transform_1(%arg0: i32, %arg1: i32) -> (i32, i32) {
    %c0_i32 = arith.constant 0 : i32
    %c0_i32_0 = arith.constant 0 : i32
    %c0_i32_1 = arith.constant 0 : i32
    return %c0_i32, %c0_i32_0 : i32, i32
  }
  func.func @transform_2(%arg0: i32, %arg1: i32) -> (i32, i32) {
    %c0_i32 = arith.constant 0 : i32
    %c0_i32_0 = arith.constant 0 : i32
    %c0_i32_1 = arith.constant 0 : i32
    return %c0_i32, %c0_i32_0 : i32, i32
  }
  func.func @transform_3(%arg0: i32, %arg1: i32) -> (i32, i32) {
    %c0_i32 = arith.constant 0 : i32
    %c0_i32_0 = arith.constant 0 : i32
    %c0_i32_1 = arith.constant 0 : i32
    return %c0_i32, %c0_i32_0 : i32, i32
  }
  func.func @transform_4(%arg0: i32, %arg1: i32) -> (i32, i32) {
    %c0_i32 = arith.constant 0 : i32
    %c0_i32_0 = arith.constant 0 : i32
    %c0_i32_1 = arith.constant 0 : i32
    return %c0_i32, %c0_i32_0 : i32, i32
  }
  func.func @transform_5(%arg0: i32, %arg1: i32) -> (i32, i32, i32) {
    %c0_i32 = arith.constant 0 : i32
    %c0_i32_0 = arith.constant 0 : i32
    return %arg0, %c0_i32, %arg1 : i32, i32, i32
  }
}

</mosaic_0001>

<bundles_post_ra>
// kernel: tpu_custom_call.1
= control target key start
LH: loop header
LB: loop body
LE: loop exit
PB: predicated region body
PF: predicated region fallthrough
CT: control target
= control target key end

     0   :  { %10 = vsyncpa [#allocation3], 0  ;;  %s958_s0 = inlined_call_operand.vmem [shape: f32[2,4,256], index: 0, kind: input, shape index: {}]   ;;  %s959_s1 = inlined_call_operand.vmem [shape: f32[32,4], index: 1, kind: input, shape index: {}]   ;;  %s960_s2 = inlined_call_operand.vmem [shape: f32[32,1], index: 2, kind: input, shape index: {}]   ;;  %s961_s3 = inlined_call_operand.vmem [shape: f32[32,32], index: 3, kind: input, shape index: {}]   ;;  %s962_s4 = inlined_call_operand.vmem [shape: f32[32,1], index: 4, kind: input, shape index: {}]   ;;  %s963_s5 = inlined_call_operand.hbm [shape: f32[2,32,256], index: 5, kind: output, shape index: {}]  }
   0x1   :  { %12 = vsyncpa [#allocation3 + $0x1], 0  ;;  %s790_s18 = smov 0   ;;  %s792_s19 = smov 0  }
   0x2   :  { %s794_s20 = smov 0   ;;  %s796_s21 = smov 0  }
   0x3   :  { %s798_s22 = smov 0   ;;  %s800_s23 = smov 0  }
   0x4 LB: > { %s583_s24 = sadd.s32 4294967295, %s755_s23   ;;  %s584_s25 = sadd.s32 4294967294, %s755_s23   ;;  %s755_s23 = sphi %s800_s23, %s18_s23   ;;  %s751_s22 = sphi %s798_s22, %s970_s22   ;;  %s747_s21 = sphi %s796_s21, %s969_s21   ;;  %s743_s20 = sphi %s794_s20, %s968_s20   ;;  %s739_s19 = sphi %s792_s19, %s967_s19   ;;  %s735_s18 = sphi %s790_s18, %s966_s18  }
   0x5   : > { %s30_s26 = sadd.s32 1, %s751_s22  ;;  %s151_s27 = sadd.s32 1, %s743_s20 }
   0x6   : > { %p32_p0 = scmp.ge.s32.totalorder %s30_s26, 2  ;;  %p161_p1 = scmp.ne.s32.totalorder %s743_s20, %s739_s19 }
   0x7   : > { %p162_p2 = scmp.eq.s32.totalorder %s583_s24, 1  ;;  %p167_p3 = scmp.ne.s32.totalorder %s739_s19, %s735_s18 }
   0x8   : > { %s972_s26 = smov (%p32_p0, %s30_s26), 0  ;;  %p168_p5 = scmp.eq.s32.totalorder %s584_s25, 1 }
   0x9   : > { %p830_p4 = por %p162_p2, %p161_p1  ;;  %s146_s29 = ssub.s32 %s751_s22, %s972_s26 }
   0xa   : > { %p587_p6 = scmp.ge.s32.totalorder %s755_s23, 1  ;;  %p149_p7 = scmp.eq.s32.totalorder %s146_s29, 0 }
   0xb   : > { %p837_p8 = por %p168_p5, %p167_p3  ;;  %p211_p9 = scmp.lt.s32.totalorder %s755_s23, 3 }
   0xc   : > { %s843_s6 = scalar_select %p149_p7, %s743_s20, %s151_s27  }
   0xd   : > { %p212_p10 = pnand %p587_p6, %p211_p9 }
   0xe   : > { %p244_p11 = scmp.lt.s32.totalorder (!%p212_p10), %s747_s21, 1  ;;  %s240_s14 = sand.u32 (!%p212_p10), 1, %s739_s19  }
   0xf   : > { %215 = sbr.rel (%p212_p10) target bundleno = 360 (0x168), region = 40  ;;  %s615_s17 = sshll.u32 (!%p212_p10), %s747_s21, 6 }
  0x10   : > { %s500_s27 = scalar_lea.hbm (!%p212_p10), %s963_s5, %s615_s17 }
  0x11   : > { %s503_s7 = sshll.u32 (!%p212_p10), %s500_s27, 4  ;;  %s504_s7 = int_to_ptr.hbm [resolvable:$true] %s503_s7 }
  0x12   : > { %s691_s8 = sshra.s32 (!%p212_p10), %s504_s7, 4  ;;  %s692_s8 = int_to_ptr.hbm [resolvable:$true] %s691_s8 }
  0x13   : > { %s693_s9 = scalar_lea.hbm (!%p212_p10), %s692_s8, 64  ;;  %p698_p1 = scmp.lt.s32.totalorder (!%p212_p10), %s692_s8, %s963_s5 }
  0x14   : > { %v260_v0 = vld [vmem:[%s960_s2 + $0x8] sm:$0xff]  ;;  %v757_v1 = vmov 0   ;;  %v262_v2 = vld [vmem:[%s960_s2 + $0x18] sm:$0xff]  ;;  %s245_s11 = scalar_select %p244_p11, %s747_s21, 1  ;;  %v259_v4 = vld [vmem:[%s960_s2] sm:$0xff]  ;;  %vm300_vm0 = vcmask 1043456  }
  0x15   : > { %675 = vset.pattern.permute.xlu1 %v757_v1  ;;  %674 = vset.pattern.permute.xlu0 %v757_v1  ;;  %v261_v5 = vld [vmem:[%s960_s2 + $0x10] sm:$0xff]  ;;  %v255_v6 = vld [vmem:[%s959_s1] sm:$0xff]  ;;  %vm287_vm1 = vcmask 31744   ;;  %v378_v10 = vld [vmem:[%s962_s4 + $0x18] sm:$0xff]  ;;  %vm399_vm2 = vcmask 261120   ;;  %s487_s21 = scalar_lea.sflag [#allocation3], %s240_s14  ;;  %p694_p12 = scmp.ne.s32.totalorder %s692_s8, %s693_s9 }
  0x16   : > { %270 = vperm.xlu1 %675, %v260_v0   ;;  %280 = vperm.xlu0 %674, %v262_v2   ;;  %s614_s12 = sshll.u32 %s245_s11, 3  ;;  %v377_v9 = vld [vmem:[%s962_s4 + $0x10] sm:$0xff]  ;;  %v256_v11 = vld [vmem:[%s959_s1 + $0x8] sm:$0xff]  ;;  %v258_v13 = vld [vmem:[%s959_s1 + $0x18] sm:$0xff] }
  0x17   : > { %676 = vset.pattern.permute.xlu2 %v757_v1  ;;  %s251_s15 = scalar_lea.vmem %s958_s0, %s614_s12  ;;  %v257_v12 = vld [vmem:[%s959_s1 + $0x10] sm:$0xff]  ;;  %v375_v34 = vld [vmem:[%s962_s4] sm:$0xff]  ;;  %v376_v44 = vld [vmem:[%s962_s4 + $0x8] sm:$0xff]  ;;  %p695_p13 = pnand %p694_p12, %p830_p4 }
  0x18   : > { %v254_v3 = vld [vmem:[%s251_s15] sm:$0xff]  ;;  %381 = vperm.xlu2 %676, %v375_v34   ;;  %v372_v45 = vld [vmem:[%s961_s3 + $0x8] sm:$0xff]  ;;  %v373_v46 = vld [vmem:[%s961_s3 + $0x10] sm:$0xff]  ;;  %s588_s15 = sshll.u32 %s240_s14, 6  ;;  %s697_s12 = scalar_lea.hbm %s963_s5, 128 }
  0x19   : > { %284 = vst [vmem:[#allocation1] ss:$2 sm:$0xff] %v254_v3  ;;  %v371_v43 = vld [vmem:[%s961_s3] sm:$0xff]  ;;  %v374_v47 = vld [vmem:[%s961_s3 + $0x18] sm:$0xff]  ;;  %s909_s16 = scalar_lea.vmem [#allocation2], %s588_s15  ;;  %p696_p0 = pneg %p695_p13 }
  0x1a   : > { %s501_s29 = sshll.u32 %s909_s16, 4  ;;  %p699_p2 = scmp.lt.s32.totalorder %s697_s12, %s693_s9  ;;  %s502_s29 = int_to_ptr.vmem [resolvable:$true] %s501_s29 }
  0x1c   : > { %p700_p3 = por %p699_p2, %p698_p1 }
  0x1e   : > { %265 = vperm.xlu1 %675, %v259_v4   ;;  %275 = vperm.xlu0 %674, %v261_v5   ;;  %p701_p5 = pnand %p700_p3, %p696_p0 }
  0x20   : > { %v285_v7 = vld.sshfl [vmem:[#allocation1] sm:$0xff pattern:$0x75316420]  ;;  %v286_v8 = vld.sshfl [vmem:[#allocation1 + $0x8] sm:$0xff pattern:$0x75316420]  ;;  %386 = vperm.xlu2 %676, %v376_v44  }
  0x21   : > { %591 = vmatpush.msk.msra.mxu0 %vm300_vm0, %v285_v7  ;;  %596 = vmatpush.msk.msra.mxu1 %vm300_vm0, %v286_v8 }
  0x22   : > { %592 = vmatmul.msk.f32.vlgmr.msra.gmra.mxu0 %vm287_vm1, %v255_v6  ;;  %597 = vmatmul.msk.f32.vlgmr.msra.gmra.mxu1 %vm287_vm1, %v255_v6 }
  0x26   : > { %391 = vperm.xlu0 %674, %v377_v9   ;;  %396 = vperm.xlu1 %675, %v378_v10  }
  0x2a   : > { %593 = vmatmul.msk.f32.gmra.mxu0 %vm287_vm1, %v256_v11  ;;  %598 = vmatmul.msk.f32.gmra.mxu1 %vm287_vm1, %v256_v11 }
  0x32   : > { %594 = vmatmul.msk.f32.gmra.mxu0 %vm287_vm1, %v257_v12  ;;  %599 = vmatmul.msk.f32.gmra.mxu1 %vm287_vm1, %v257_v12 }
  0x3a   : > { %595 = vmatmul.msk.f32.gmra.mxu0 %vm287_vm1, %v258_v13  ;;  %600 = vmatmul.msk.f32.gmra.mxu1 %vm287_vm1, %v258_v13 }
  0x72   : > { %v382_v48 = vpop.permute.xlu2 %381 }
  0x7a   : > { %v387_v55 = vpop.permute.xlu2 %386 }
  0x88   : > { %v281_v18 = vpop.permute.xlu0 %280  ;;  %v271_v19 = vpop.permute.xlu1 %270 }
  0x90   : > { %v276_v22 = vpop.permute.xlu0 %275  ;;  %v266_v29 = vpop.permute.xlu1 %265 }
  0x98   : > { %v392_v62 = vpop.permute.xlu0 %391  ;;  %v397_v5 = vpop.permute.xlu1 %396 }
  0x9f   : > { %v322_v14 = vpop.f32.mrf.mxu0  ;;  %v351_v15 = vpop.f32.mrf.mxu1 }
  0xa0   : > { %v323_v35 = vadd.f32 %v322_v14, %v266_v29  ;;  %v352_v36 = vadd.f32 %v351_v15, %v266_v29 }
  0xa2   : > { %v363_v41 = vmax.f32 %v323_v35, 0.0  ;;  %v364_v42 = vmax.f32 %v352_v36, 0.0 }
  0xa7   : > { %v325_v16 = vpop.f32.mrf.mxu0  ;;  %v354_v17 = vpop.f32.mrf.mxu1 }
  0xa8   : > { %v326_v30 = vadd.f32 %v325_v16, %v271_v19  ;;  %v355_v31 = vadd.f32 %v354_v17, %v271_v19 }
  0xaa   : > { %v365_v39 = vmax.f32 %v326_v30, 0.0  ;;  %v366_v40 = vmax.f32 %v355_v31, 0.0 }
  0xaf   : > { %v328_v20 = vpop.f32.mrf.mxu0  ;;  %v357_v21 = vpop.f32.mrf.mxu1 }
  0xb0   : > { %v329_v25 = vadd.f32 %v328_v20, %v276_v22  ;;  %v358_v26 = vadd.f32 %v357_v21, %v276_v22 }
  0xb2   : > { %v367_v37 = vmax.f32 %v329_v25, 0.0  ;;  %v368_v38 = vmax.f32 %v358_v26, 0.0 }
  0xb7   : > { %v331_v23 = vpop.f32.mrf.mxu0  ;;  %v360_v24 = vpop.f32.mrf.mxu1 }
  0xb8   : > { %v332_v27 = vadd.f32 %v331_v23, %v281_v18  ;;  %v361_v28 = vadd.f32 %v360_v24, %v281_v18 }
  0xba   : > { %v369_v32 = vmax.f32 %v332_v27, 0.0  ;;  %v370_v33 = vmax.f32 %v361_v28, 0.0 }
  0xbc   : > { %424 = vmatpush.msra.mxu2 %v369_v32  ;;  %453 = vmatpush.msra.mxu3 %v370_v33 }
  0xbe   : > { %425 = vmatpush.msra.mxu2 %v367_v37  ;;  %454 = vmatpush.msra.mxu3 %v368_v38 }
  0xc0   : > { %426 = vmatpush.msra.mxu2 %v365_v39  ;;  %455 = vmatpush.msra.mxu3 %v366_v40 }
  0xc2   : > { %427 = vmatpush.msra.mxu2 %v363_v41  ;;  %456 = vmatpush.msra.mxu3 %v364_v42 }
  0xc3   : > { %601 = vmatmul.msk.f32.vlgmr.msra.gmra.mxu2 %vm399_vm2, %v371_v43  ;;  %605 = vmatmul.msk.f32.vlgmr.msra.gmra.mxu3 %vm399_vm2, %v371_v43 }
  0xcb   : > { %602 = vmatmul.msk.f32.gmra.mxu2 %vm399_vm2, %v372_v45  ;;  %606 = vmatmul.msk.f32.gmra.mxu3 %vm399_vm2, %v372_v45 }
  0xd3   : > { %603 = vmatmul.msk.f32.gmra.mxu2 %vm399_vm2, %v373_v46  ;;  %607 = vmatmul.msk.f32.gmra.mxu3 %vm399_vm2, %v373_v46 }
  0xdb   : > { %604 = vmatmul.msk.f32.gmra.mxu2 %vm399_vm2, %v374_v47  ;;  %608 = vmatmul.msk.f32.gmra.mxu3 %vm399_vm2, %v374_v47 }
 0x146   : > { %v429_v49 = vpop.f32.mrf.mxu2  ;;  %v458_v50 = vpop.f32.mrf.mxu3 }
 0x147   : > { %v430_v51 = vadd.f32 %v429_v49, %v382_v48  ;;  %v459_v52 = vadd.f32 %v458_v50, %v382_v48 }
 0x149   : > { %v470_v53 = vmax.f32 %v430_v51, 0.0  ;;  %v471_v54 = vmax.f32 %v459_v52, 0.0 }
 0x14b   : > { %478 = vst [vmem:[%s909_s16] sm:$0xff] %v470_v53 }
 0x14c   : > { %479 = vst [vmem:[%s909_s16 + $0x8] sm:$0xff] %v471_v54 }
 0x14e   : > { %v432_v56 = vpop.f32.mrf.mxu2  ;;  %v461_v57 = vpop.f32.mrf.mxu3 }
 0x14f   : > { %v433_v58 = vadd.f32 %v432_v56, %v387_v55  ;;  %v462_v59 = vadd.f32 %v461_v57, %v387_v55 }
 0x151   : > { %v472_v60 = vmax.f32 %v433_v58, 0.0  ;;  %v473_v61 = vmax.f32 %v462_v59, 0.0 }
 0x153   : > { %480 = vst [vmem:[%s909_s16 + $0x10] sm:$0xff] %v472_v60 }
 0x154   : > { %481 = vst [vmem:[%s909_s16 + $0x18] sm:$0xff] %v473_v61 }
 0x156   : > { %v435_v63 = vpop.f32.mrf.mxu2  ;;  %v464_v0 = vpop.f32.mrf.mxu3 }
 0x157   : > { %v436_v1 = vadd.f32 %v435_v63, %v392_v62  ;;  %v465_v2 = vadd.f32 %v464_v0, %v392_v62 }
 0x159   : > { %v474_v3 = vmax.f32 %v436_v1, 0.0  ;;  %v475_v4 = vmax.f32 %v465_v2, 0.0 }
 0x15b   : > { %482 = vst [vmem:[%s909_s16 + $0x20] sm:$0xff] %v474_v3 }
 0x15c   : > { %483 = vst [vmem:[%s909_s16 + $0x28] sm:$0xff] %v475_v4 }
 0x15e   : > { %v438_v6 = vpop.f32.mrf.mxu2  ;;  %v467_v7 = vpop.f32.mrf.mxu3 }
 0x15f   : > { %v439_v8 = vadd.f32 %v438_v6, %v397_v5  ;;  %v468_v9 = vadd.f32 %v467_v7, %v397_v5 }
 0x161   : > { %v476_v10 = vmax.f32 %v439_v8, 0.0  ;;  %v477_v11 = vmax.f32 %v468_v9, 0.0 }
 0x163   : > { %484 = vst [vmem:[%s909_s16 + $0x30] sm:$0xff] %v476_v10 }
 0x164   : > { %485 = vst [vmem:[%s909_s16 + $0x38] sm:$0xff] %v477_v11 }
 0x165   : > { %704 = shalt.err (!%p701_p5)
}
 0x166   : > { %s758_s14 = smov 256   ;;  %s759_s16 = smov 16  }
 0x167   : > { %616 = dma.vmem_to_hbm [thread:$0]  (%p830_p4), %s502_s29, 1024, %s504_s7, %s487_s21, %s758_s14, %s758_s14, %s759_s16  }
 0x168 PF: > { %p622_p6 = scmp.ge.s32.totalorder %s755_s23, 2  ;;  %s518_s17 = sand.u32 1, %s735_s18  }
 0x169   : > { %s519_s24 = scalar_lea.sflag [#allocation3], %s518_s17 }
 0x16a   : > { %p619_p7 = pnand %p622_p6, %p837_p8 }
 0x16c   : > { %p620_p9 = pneg %p619_p7 }
 0x16e   : > { %730 = dma.done.wait (%p620_p9), %s519_s24, 1024  }
 0x16f   : > { %732 = vsyncadd (%p620_p9), %s519_s24, 4294966272  ;;  %s18_s23 = sadd.s32 1, %s755_s23   ;;  %s966_s18 = smov %s739_s19 }
 0x170   : > { %p15_p10 = scmp.ge.s32.totalorder %s18_s23, 4   ;;  %s967_s19 = smov %s743_s20 }
 0x171   : > { %s968_s20 = smov %s843_s6  ;;  %s969_s21 = smov %s751_s22 }
 0x172   : > { %s970_s22 = smov %s972_s26  ;;  %17 = sbr.rel (!%p15_p10) target bundleno = 4 (0x4), region = 75 }
 0x177   :  { %525 = vsyncpa [#allocation3], 1 }
 0x178   :  { %527 = vsyncpa [#allocation3 + $0x1], 1 }

</bundles_post_ra>
